<compile_context>
chip_gen: v5e
topology: v5e:2x2
jax: 0.10.0
libtpu: 0.0.40
codegen_flags: <defaults>
</compile_context>

<pallas_src>
import jax
import jax.numpy as jnp
import numpy as np
from jax.experimental import pallas as pl
from jax.experimental.pallas import tpu as pltpu

LANES = 128
SUBLANES = 8


def _round_up(x, m):
    return ((x + m - 1) // m) * m


def _vmem_capacity_bytes():
    try:
        return int(pltpu.get_tpu_info().vmem_capacity_bytes)
    except Exception:
        return 64 << 20  # conservative fallback (v7x per-TensorCore VMEM)


# ----------------------------------------------------------------------------
# Fused kernel: im2col-in-K conv + bias + ReLU + mask + max-pool + FC
#   x_ref    : (bt*S_pad, E)          bf16   (pre-flattened in the wrapper)
#   w_ref    : (max_fs*E, h_pad)      bf16   (tap k lives in rows [k*E,(k+1)*E))
#   bias_ref : (1, h_pad)             f32
#   mask_ref : (S_pad, h_pad)         f32    (1.0 where t + fs_c <= S, else 0.0)
#   fcw_ref  : (h_pad, c_pad)         f32
#   fcb_ref  : (1, c_pad)             f32
#   o_ref    : (bt, c_pad)            f32
# ----------------------------------------------------------------------------
def textcnn_kernel(x_ref, w_ref, bias_ref, mask_ref, fcw_ref, fcb_ref, o_ref):
    n, e = x_ref.shape
    s, h_pad = mask_ref.shape
    bt = n // s
    max_fs = w_ref.shape[0] // e

    # Build the im2col operand A[r] = concat_k x[r + k].  Rolls are done on a
    # small f32 copy (sublane rolls on f32 are the cheap, robustly-lowered
    # path); wrap-around / cross-sentence rows are zeroed by the mask below.
    x32 = x_ref[...].astype(jnp.float32)                      # (n, E), tiny
    cols = [x32]
    for k in range(1, max_fs):
        cols.append(pltpu.roll(x32, shift=n - k, axis=0))     # x[(r+k) mod n]
    a = jnp.concatenate(cols, axis=-1).astype(jnp.bfloat16)   # (n, max_fs*E)

    # One MXU matmul over the full K = max_fs*E contraction, f32 accumulation.
    acc = jnp.dot(a, w_ref[...], preferred_element_type=jnp.float32)  # (n, h_pad)

    # Bias + ReLU, then zero out-of-range positions (t + fs > S), padded seq
    # rows and padded channels with the precomputed 0/1 mask.
    acc = jnp.maximum(acc + bias_ref[...], 0.0)
    acc = acc.reshape(bt, s, h_pad) * mask_ref[...]           # (bt, S_pad, h_pad)

    # Max-over-time pooling (valid post-ReLU values are >= 0 >= masked zeros).
    pooled = jnp.max(acc, axis=1)                              # (bt, h_pad)

    # Dropout: eval-mode identity.
    # Fused FC epilogue in f32 (tiny matmul, lane-dense c_pad=128 store).
    o_ref[...] = (jnp.dot(pooled, fcw_ref[...], preferred_element_type=jnp.float32)
                  + fcb_ref[...])


# ----------------------------------------------------------------------------
# Batch-tile selection: biggest VMEM-fitting multiple-of-8 divisor of B,
# preferring >= 2 grid steps (keeps both v7x TensorCores busy).
# ----------------------------------------------------------------------------
def _pick_bt(B, s_pad, e, max_fs, h_pad, budget_bytes):
    bytes_per_row = (2 * 2 * e            # bf16 x block, double-buffered
                     + 4 * e * max_fs     # f32 upcast + rolled copies
                     + 2 * e * max_fs     # bf16 im2col operand
                     + 2 * 4 * h_pad)     # f32 matmul result + masked copy
    bt_cap = max(budget_bytes // bytes_per_row // s_pad, 1)
    if B <= 8:
        return B                                           # tiny batch: 1 tile
    divs = [d for d in range(8, min(B, bt_cap) + 1, 8) if B % d == 0]
    if divs:
        two_step = [d for d in divs if B // d >= 2]
        return max(two_step) if two_step else max(divs)
    if B <= bt_cap:
        return B                                           # ragged but fits
    return max(min(bt_cap, 256) // 8 * 8, 8)               # caller pads batch


# ----------------------------------------------------------------------------
# Wrapper: single pallas_call, batch-tiled grid
# ----------------------------------------------------------------------------
def cnn_forward(x, params):
    B, S, E = x.shape
    max_fs = params["max_fs"]
    assert S >= max_fs, f"seq_len ({S}) must be >= max filter size ({max_fs})"
    h_pad, c_pad = params["h_pad"], params["c_pad"]

    # Generation-aware VMEM budget (v7x: 64 MiB physical; v5e/v6e: 128 MiB).
    vmem_cap = _vmem_capacity_bytes()
    vmem_limit = int(min(vmem_cap * 3 // 4, 96 << 20))
    budget = vmem_limit // 3

    S_pad = _round_up(S, SUBLANES)          # keeps the in-kernel reshape free
    bt = _pick_bt(B, S_pad, E, max_fs, h_pad, budget)
    Bp = _round_up(B, bt)

    # bf16 pre-cast + flatten in the wrapper: halves streamed HBM bytes and
    # removes the in-kernel reshape/cast of the only per-step operand.
    xb = x.astype(jnp.bfloat16)
    if S_pad != S:
        xb = jnp.pad(xb, ((0, 0), (0, S_pad - S), (0, 0)))
    if Bp != B:
        # Only reached when B has no fitting multiple-of-8 divisor.
        xb = jnp.pad(xb, ((0, Bp - B), (0, 0), (0, 0)))
    x_flat = xb.reshape(Bp * S_pad, E)

    # Precomputed validity mask (built against the ORIGINAL S, not S_pad):
    # position t is valid for channel c iff t + fs_c <= S.  Padded channels
    # carry a huge fs so they are never valid.
    t = np.arange(S_pad, dtype=np.int64)[:, None]
    mask = jnp.asarray((t + params["fs_np"] <= S).astype(np.float32))  # (S_pad, h_pad)

    logits = pl.pallas_call(
        textcnn_kernel,
        out_shape=jax.ShapeDtypeStruct((Bp, c_pad), jnp.float32),
        grid_spec=pltpu.PrefetchScalarGridSpec(
            num_scalar_prefetch=0,
            grid=(Bp // bt,),
            in_specs=[
                pl.BlockSpec((bt * S_pad, E), lambda i: (i, 0)),     # streamed
                pl.BlockSpec((max_fs * E, h_pad), lambda i: (0, 0)),  # resident
                pl.BlockSpec((1, h_pad), lambda i: (0, 0)),
                pl.BlockSpec((S_pad, h_pad), lambda i: (0, 0)),
                pl.BlockSpec((h_pad, c_pad), lambda i: (0, 0)),
                pl.BlockSpec((1, c_pad), lambda i: (0, 0)),
            ],
            out_specs=pl.BlockSpec((bt, c_pad), lambda i: (i, 0)),
        ),
        compiler_params=pltpu.CompilerParams(
            dimension_semantics=("parallel",),   # shards batch tiles across TCs
            vmem_limit_bytes=vmem_limit,
        ),
    )(x_flat, params["w_taps"], params["bias"], mask,
      params["fc_w"], params["fc_b"])

    # Strip batch / lane padding.
    return logits[:B, :params["num_classes"]]


# ----------------------------------------------------------------------------
# Parameter construction (PyTorch layout) + repacking into fused-kernel layout
# ----------------------------------------------------------------------------
def init_torch_params(key, num_filters, filter_sizes, embedding_dim, num_classes):
    convs = []
    for i, fs in enumerate(filter_sizes):
        kw, kb = jax.random.split(jax.random.fold_in(key, i))
        w = 0.1 * jax.random.normal(kw, (num_filters, 1, fs, embedding_dim), jnp.float32)
        b = 0.1 * jax.random.normal(kb, (num_filters,), jnp.float32)
        convs.append((fs, w, b))
    kfw, kfb = jax.random.split(jax.random.fold_in(key, 1000))
    H = num_filters * len(filter_sizes)
    fc_w = 0.1 * jax.random.normal(kfw, (num_classes, H), jnp.float32)
    fc_b = 0.1 * jax.random.normal(kfb, (num_classes,), jnp.float32)
    return {"convs": convs, "fc_w": fc_w, "fc_b": fc_b}


def pack_params(tp):
    convs = tp["convs"]
    F = convs[0][1].shape[0]
    E = convs[0][1].shape[3]
    H = F * len(convs)
    num_classes = tp["fc_w"].shape[0]
    max_fs = max(fs for fs, _, _ in convs)
    h_pad = max(_round_up(H, LANES), LANES)
    c_pad = max(_round_up(num_classes, LANES), LANES)

    # Conv taps packed along K (im2col layout): rows [k*E, (k+1)*E) hold tap k.
    # Filters shorter than max_fs contribute zero rows for their missing taps.
    w_taps = np.zeros((max_fs * E, h_pad), np.float32)
    bias = np.zeros((1, h_pad), np.float32)
    fs_np = np.full((1, h_pad), 1 << 20, np.int64)   # pad channels: never valid
    for g, (fs, w, b) in enumerate(convs):
        w = np.asarray(w, np.float32)                # (F, 1, fs, E)
        c0 = g * F
        for k in range(fs):
            w_taps[k * E:(k + 1) * E, c0:c0 + F] = w[:, 0, k, :].T
        bias[0, c0:c0 + F] = np.asarray(b, np.float32)
        fs_np[0, c0:c0 + F] = fs

    fc_w = np.zeros((h_pad, c_pad), np.float32)
    fc_w[:H, :num_classes] = np.asarray(tp["fc_w"], np.float32).T
    fc_b = np.zeros((1, c_pad), np.float32)
    fc_b[0, :num_classes] = np.asarray(tp["fc_b"], np.float32)

    return {
        "w_taps": jnp.asarray(w_taps, jnp.bfloat16),   # bf16 conv matmul weights
        "bias": jnp.asarray(bias),
        "fs_np": fs_np,                                # host-side, builds the mask
        "fc_w": jnp.asarray(fc_w),                     # f32 FC (tiny, tighter error)
        "fc_b": jnp.asarray(fc_b),
        "max_fs": max_fs,
        "h_pad": h_pad,
        "c_pad": c_pad,
        "num_classes": num_classes,
    }


# ----------------------------------------------------------------------------
# Pure-JAX reference of the PyTorch forward (for correctness checking)
# ----------------------------------------------------------------------------
def reference_forward(x, tp):
    B, S, E = x.shape
    feats = []
    for (fs, w, b) in tp["convs"]:
        T = S - fs + 1
        out = jnp.zeros((B, T, w.shape[0]), jnp.float32)
        for k in range(fs):
            out = out + jnp.einsum("bte,fe->btf", x[:, k:k + T, :], w[:, 0, k, :])
        out = jnp.maximum(out + b[None, None, :], 0.0)
        feats.append(jnp.max(out, axis=1))
    h = jnp.concatenate(feats, axis=1)
    return h @ tp["fc_w"].T + tp["fc_b"][None, :]


if __name__ == "__main__":
    key = jax.random.PRNGKey(0)

    seq_len = 16
    embedding_dim = 32
    num_filters = 8
    filter_sizes = (2, 3, 4)
    num_classes = 2

    kx, kp, kx2 = jax.random.split(key, 3)
    tparams = init_torch_params(kp, num_filters, filter_sizes, embedding_dim, num_classes)
    params = pack_params(tparams)

    # Small batch (single-tile path).
    x = jax.random.normal(kx, (2, seq_len, embedding_dim), jnp.float32)
    logits = cnn_forward(x, params)
    jax.block_until_ready(logits)
    assert logits.shape == (2, num_classes), logits.shape
    ref = reference_forward(x, tparams)
    err = float(jnp.max(jnp.abs(logits - ref)))
    assert err < 5e-2, f"max abs err vs reference (B=2): {err}"

    # Larger batch exercising the multi-tile (grid >= 2, megacore) path.
    x2 = jax.random.normal(kx2, (32, seq_len, embedding_dim), jnp.float32)
    logits2 = cnn_forward(x2, params)
    jax.block_until_ready(logits2)
    ref2 = reference_forward(x2, tparams)
    err2 = float(jnp.max(jnp.abs(logits2 - ref2)))
    assert err2 < 5e-2, f"max abs err vs reference (B=32): {err2}"

    print("KERNEL_OK")
</pallas_src>

<mosaic_0001>
module attributes {stable_mosaic.version = 11 : i64} {
  func.func @textcnn_kernel(%arg0: i32, %arg1: memref<32x32xbf16, #tpu.memory_space<vmem>>, %arg2: memref<128x128xbf16, #tpu.memory_space<vmem>>, %arg3: memref<1x128xf32, #tpu.memory_space<vmem>>, %arg4: memref<16x128xf32, #tpu.memory_space<vmem>>, %arg5: memref<128x128xf32, #tpu.memory_space<vmem>>, %arg6: memref<1x128xf32, #tpu.memory_space<vmem>>, %arg7: memref<2x128xf32, #tpu.memory_space<vmem>>) attributes {dimension_semantics = [#tpu.dimension_semantics<parallel>], iteration_bounds = array<i64: 1>, scalar_prefetch = 0 : i64, scratch_operands = 0 : i64, tpu.core_type = #tpu.core_type<tc>, window_params = [{transform_indices = @transform_0, window_bounds = array<i64: 32, 32>}, {pipeline_mode = #tpu.pipeline_mode<synchronous>, transform_indices = @transform_1, window_bounds = array<i64: 128, 128>}, {pipeline_mode = #tpu.pipeline_mode<synchronous>, transform_indices = @transform_2, window_bounds = array<i64: 1, 128>}, {pipeline_mode = #tpu.pipeline_mode<synchronous>, transform_indices = @transform_3, window_bounds = array<i64: 16, 128>}, {pipeline_mode = #tpu.pipeline_mode<synchronous>, transform_indices = @transform_4, window_bounds = array<i64: 128, 128>}, {pipeline_mode = #tpu.pipeline_mode<synchronous>, transform_indices = @transform_5, window_bounds = array<i64: 1, 128>}, {transform_indices = @transform_6, window_bounds = array<i64: 2, 128>}]} {
    %c0 = arith.constant 0 : index
    %c0_0 = arith.constant 0 : index
    %0 = vector.load %arg1[%c0, %c0_0] : memref<32x32xbf16, #tpu.memory_space<vmem>>, vector<32x32xbf16>
    %1 = arith.extf %0 : vector<32x32xbf16> to vector<32x32xf32>
    %c31_i32 = arith.constant 31 : i32
    %2 = tpu.dynamic_rotate %1 by %c31_i32 dim 0 : vector<32x32xf32>, i32 -> vector<32x32xf32>
    %c30_i32 = arith.constant 30 : i32
    %3 = tpu.dynamic_rotate %1 by %c30_i32 dim 0 : vector<32x32xf32>, i32 -> vector<32x32xf32>
    %c29_i32 = arith.constant 29 : i32
    %4 = tpu.dynamic_rotate %1 by %c29_i32 dim 0 : vector<32x32xf32>, i32 -> vector<32x32xf32>
    %5 = tpu.concatenate %1, %2, %3, %4 in 1 : vector<32x32xf32>, vector<32x32xf32>, vector<32x32xf32>, vector<32x32xf32> -> vector<32x128xf32>
    %6 = arith.truncf %5 : vector<32x128xf32> to vector<32x128xbf16>
    %c0_1 = arith.constant 0 : index
    %c0_2 = arith.constant 0 : index
    %7 = vector.load %arg2[%c0_1, %c0_2] : memref<128x128xbf16, #tpu.memory_space<vmem>>, vector<128x128xbf16>
    %cst = arith.constant dense<0.000000e+00> : vector<32x128xf32>
    %8 = tpu.matmul %6, %7, %cst {dimension_numbers = #tpu.dot_dimension_numbers<[1], [0], [0], [1], [0, 0, 1, 1], [], []>} : vector<32x128xbf16>, vector<128x128xbf16>, vector<32x128xf32> -> vector<32x128xf32>
    %c0_3 = arith.constant 0 : index
    %c0_4 = arith.constant 0 : index
    %9 = vector.load %arg3[%c0_3, %c0_4] : memref<1x128xf32, #tpu.memory_space<vmem>>, vector<1x128xf32>
    %10 = vector.broadcast %9 : vector<1x128xf32> to vector<32x128xf32>
    %11 = arith.addf %8, %10 : vector<32x128xf32>
    %cst_5 = arith.constant 0.000000e+00 : f32
    %12 = vector.broadcast %cst_5 : f32 to vector<32x128xf32>
    %13 = arith.maximumf %11, %12 : vector<32x128xf32>
    %14 = vector.shape_cast %13 : vector<32x128xf32> to vector<2x16x128xf32>
    %c0_6 = arith.constant 0 : index
    %c0_7 = arith.constant 0 : index
    %15 = vector.load %arg4[%c0_6, %c0_7] : memref<16x128xf32, #tpu.memory_space<vmem>>, vector<16x128xf32>
    %16 = vector.shape_cast %15 : vector<16x128xf32> to vector<1x16x128xf32>
    %17 = vector.broadcast %16 : vector<1x16x128xf32> to vector<2x16x128xf32>
    %18 = arith.mulf %14, %17 : vector<2x16x128xf32>
    %cst_8 = arith.constant dense<0xFF800000> : vector<2x128xf32>
    %19 = vector.multi_reduction <maximumf>, %18, %cst_8 [1] : vector<2x16x128xf32> to vector<2x128xf32>
    %c0_9 = arith.constant 0 : index
    %c0_10 = arith.constant 0 : index
    %20 = vector.load %arg5[%c0_9, %c0_10] : memref<128x128xf32, #tpu.memory_space<vmem>>, vector<128x128xf32>
    %cst_11 = arith.constant dense<0.000000e+00> : vector<2x128xf32>
    %21 = tpu.matmul %19, %20, %cst_11 {dimension_numbers = #tpu.dot_dimension_numbers<[1], [0], [0], [1], [0, 0, 1, 1], [], []>} : vector<2x128xf32>, vector<128x128xf32>, vector<2x128xf32> -> vector<2x128xf32>
    %c0_12 = arith.constant 0 : index
    %c0_13 = arith.constant 0 : index
    %22 = vector.load %arg6[%c0_12, %c0_13] : memref<1x128xf32, #tpu.memory_space<vmem>>, vector<1x128xf32>
    %23 = vector.broadcast %22 : vector<1x128xf32> to vector<2x128xf32>
    %24 = arith.addf %21, %23 : vector<2x128xf32>
    %c0_14 = arith.constant 0 : index
    %c0_15 = arith.constant 0 : index
    %25 = vector.load %arg7[%c0_14, %c0_15] : memref<2x128xf32, #tpu.memory_space<vmem>>, vector<2x128xf32>
    tpu.vector_store %arg7[%c0_14, %c0_15], %24 {strides = array<i32>} : memref<2x128xf32, #tpu.memory_space<vmem>>, vector<2x128xf32>,
    return
  }
  func.func @transform_0(%arg0: i32) -> (i32, i32) {
    %c0_i32 = arith.constant 0 : i32
    %c0_i32_0 = arith.constant 0 : i32
    return %arg0, %c0_i32 : i32, i32
  }
  func.func @transform_1(%arg0: i32) -> (i32, i32) {
    %c0_i32 = arith.constant 0 : i32
    %c0_i32_0 = arith.constant 0 : i32
    %c0_i32_1 = arith.constant 0 : i32
    return %c0_i32, %c0_i32_0 : i32, i32
  }
  func.func @transform_2(%arg0: i32) -> (i32, i32) {
    %c0_i32 = arith.constant 0 : i32
    %c0_i32_0 = arith.constant 0 : i32
    %c0_i32_1 = arith.constant 0 : i32
    return %c0_i32, %c0_i32_0 : i32, i32
  }
  func.func @transform_3(%arg0: i32) -> (i32, i32) {
    %c0_i32 = arith.constant 0 : i32
    %c0_i32_0 = arith.constant 0 : i32
    %c0_i32_1 = arith.constant 0 : i32
    return %c0_i32, %c0_i32_0 : i32, i32
  }
  func.func @transform_4(%arg0: i32) -> (i32, i32) {
    %c0_i32 = arith.constant 0 : i32
    %c0_i32_0 = arith.constant 0 : i32
    %c0_i32_1 = arith.constant 0 : i32
    return %c0_i32, %c0_i32_0 : i32, i32
  }
  func.func @transform_5(%arg0: i32) -> (i32, i32) {
    %c0_i32 = arith.constant 0 : i32
    %c0_i32_0 = arith.constant 0 : i32
    %c0_i32_1 = arith.constant 0 : i32
    return %c0_i32, %c0_i32_0 : i32, i32
  }
  func.func @transform_6(%arg0: i32) -> (i32, i32) {
    %c0_i32 = arith.constant 0 : i32
    %c0_i32_0 = arith.constant 0 : i32
    return %arg0, %c0_i32 : i32, i32
  }
}

</mosaic_0001>

<bundles_post_ra>
// kernel: tpu_custom_call.1
= control target key start
LH: loop header
LB: loop body
LE: loop exit
PB: predicated region body
PF: predicated region fallthrough
CT: control target
= control target key end

     0   :  { %11 = vsyncpa [#allocation3], 0  ;;  %s710_s0 = inlined_call_operand.hbm [shape: bf16[32,32], index: 0, kind: input, shape index: {}]   ;;  %s711_s1 = inlined_call_operand.hbm [shape: bf16[128,128], index: 1, kind: input, shape index: {}]   ;;  %s712_s2 = inlined_call_operand.vmem [shape: f32[1,128], index: 2, kind: input, shape index: {}]   ;;  %s713_s3 = inlined_call_operand.hbm [shape: f32[16,128], index: 3, kind: input, shape index: {}]   ;;  %s714_s4 = inlined_call_operand.hbm [shape: f32[128,128], index: 4, kind: input, shape index: {}]   ;;  %s715_s5 = inlined_call_operand.vmem [shape: f32[1,128], index: 5, kind: input, shape index: {}]   ;;  %s716_s6 = inlined_call_operand.hbm [shape: f32[2,128], index: 6, kind: output, shape index: {}]  }
   0x1   :  { %12 = vsyncpa [#allocation6], 0 }
   0x2   :  { %13 = vsyncpa [#allocation9], 0 }
   0x3   :  { %14 = vsyncpa [#allocation4], 0  ;;  %s32_s23 = sshll.u32 %s711_s1, 4  ;;  %s593_s24 = smov [#allocation5]   ;;  %s33_s23 = int_to_ptr.hbm [resolvable:$true] %s32_s23 }
   0x4   :  { %s34_s25 = sshll.u32 %s593_s24, 4  ;;  %s19_s28 = sshll.u32 %s710_s0, 4  ;;  %s35_s25 = int_to_ptr.vmem [resolvable:$true] %s34_s25  ;;  %s20_s28 = int_to_ptr.hbm [resolvable:$true] %s19_s28 }
   0x5   :  { %s594_s29 = smov 64   ;;  %s595_s30 = smov 4  }
   0x6   :  { %40 = dma.hbm_to_vmem [thread:$0]  %s33_s23, 1024, %s35_s25, [#allocation6], %s594_s29, %s594_s29, %s595_s30  }
   0x7   :  { %s596_s7 = smov [#allocation2]   ;;  %s47_s1 = sshll.u32 %s713_s3, 4  ;;  %s48_s1 = int_to_ptr.hbm [resolvable:$true] %s47_s1 }
   0x8   :  { %s21_s8 = sshll.u32 %s596_s7, 4  ;;  %s597_s11 = smov [#allocation7]   ;;  %s22_s8 = int_to_ptr.vmem [resolvable:$true] %s21_s8 }
   0x9   :  { %27 = dma.hbm_to_vmem [thread:$0]  %s20_s28, 256, %s22_s8, [#allocation3], %s594_s29, %s594_s29, %s595_s30  }
   0xa   :  { %s49_s12 = sshll.u32 %s597_s11, 4  ;;  %s60_s14 = sshll.u32 %s714_s4, 4  ;;  %s50_s12 = int_to_ptr.vmem [resolvable:$true] %s49_s12  ;;  %s61_s14 = int_to_ptr.hbm [resolvable:$true] %s60_s14 }
   0xb   :  { %s598_s15 = smov 128   ;;  %s599_s16 = smov 8  }
   0xc   :  { %55 = dma.hbm_to_vmem [thread:$0]  %s48_s1, 256, %s50_s12, [#allocation6], %s598_s15, %s598_s15, %s599_s16  }
   0xd   :  { %s600_s17 = smov [#allocation8]  }
   0xe   :  { %s62_s18 = sshll.u32 %s600_s17, 4  ;;  %s63_s18 = int_to_ptr.vmem [resolvable:$true] %s62_s18 }
   0xf   :  { %68 = dma.hbm_to_vmem [thread:$0]  %s61_s14, 2048, %s63_s18, [#allocation9], %s598_s15, %s598_s15, %s599_s16  }
  0x10   :  { %585 = dma.done.wait [#allocation3], 256  }
  0x11   :  { %586 = vsyncadd [#allocation3], 4294967040 }
  0x12   :  { %587 = dma.done.wait [#allocation6], 1280  }
  0x13   :  { %588 = vsyncadd [#allocation6], 4294966016 }
  0x14   :  { %589 = dma.done.wait [#allocation9], 2048  }
  0x15   :  { %590 = vsyncadd [#allocation9], 4294965248  ;;  %v99_v0 = vlaneseq  ;;  %v406_v2 = vld [vmem:[#allocation2] sm:$0xff]   ;;  %v413_v3 = vld [vmem:[#allocation2 + $0x8] sm:$0xff]   ;;  %s601_s3 = smov 96   ;;  %s602_s4 = smov 32  }
  0x16   :  { %v404_v4 = vld [vmem:[#allocation5 + $0x38] sm:$0xff]  ;;  %v655_v5 = vunpack.c.l.bf16 %v406_v2  ;;  %v657_v6 = vunpack.c.h.bf16 %v406_v2  ;;  %v659_v7 = vunpack.c.l.bf16 %v413_v3  ;;  %v661_v8 = vunpack.c.h.bf16 %v413_v3  ;;  %v403_v9 = vld [vmem:[#allocation5 + $0x30] sm:$0xff]  ;;  %v402_v26 = vld [vmem:[#allocation5 + $0x28] sm:$0xff]  ;;  %s603_s22 = smov [#allocation10]   ;;  %s353_s26 = sshll.u32 %s716_s6, 4  ;;  %s354_s26 = int_to_ptr.hbm [resolvable:$true] %s353_s26 }
  0x17   :  { %v100_v1 = vshrl.u32 %v99_v0, 7  ;;  %414 = vmatpush.bf16.msra.mxu2 %v404_v4  ;;  %257 = vmatpush.bf16.msra.mxu0 %v404_v4  ;;  %v401_v36 = vld [vmem:[#allocation5 + $0x20] sm:$0xff]  ;;  %v400_v41 = vld [vmem:[#allocation5 + $0x18] sm:$0xff]  ;;  %v399_v43 = vld [vmem:[#allocation5 + $0x10] sm:$0xff]  ;;  %vm172_vm3 = vcmask 261120   ;;  %vm177_vm4 = vcmask 523264  }
  0x18   :  { %v115_v10 = vrot.slane %v655_v5, 3  ;;  %v117_v11 = vrot.slane %v659_v7, 3  ;;  %v118_v12 = vrot.slane %v661_v8, 3  ;;  %v95_v13 = vrot.slane %v655_v5, 1  ;;  %v398_v44 = vld [vmem:[#allocation5 + $0x8] sm:$0xff]  ;;  %v397_v45 = vld [vmem:[#allocation5] sm:$0xff] }
  0x19   :  { %vm119_vm0 = vcmp.lt.s32.totalorder %v100_v1, 5  ;;  %vm101_vm1 = vcmp.lt.s32.totalorder %v100_v1, 7  ;;  %v97_v14 = vrot.slane %v659_v7, 1  ;;  %v98_v15 = vrot.slane %v661_v8, 1  ;;  %s351_s23 = sshll.u32 %s603_s22, 4  ;;  %s352_s23 = int_to_ptr.vmem [resolvable:$true] %s351_s23 }
  0x1a   :  { %v106_v16 = vrot.slane %v655_v5, 2  ;;  %v108_v17 = vrot.slane %v659_v7, 2  ;;  %v120_v18 = vsel %vm119_vm0, %v117_v11, %v118_v12  ;;  %v123_v19 = vsel %vm119_vm0, %v118_v12, %v115_v10 }
  0x1b   :  { %v109_v20 = vrot.slane %v661_v8, 2  ;;  %v96_v21 = vrot.slane %v657_v6, 1  ;;  %v443_v22 = vpack.i.bf16 %v123_v19, %v120_v18  ;;  %v102_v23 = vsel %vm101_vm1, %v97_v14, %v98_v15  ;;  %415 = vmatpush.bf16.msra.mxu2 %v403_v9  ;;  %258 = vmatpush.bf16.msra.mxu0 %v403_v9  ;;  %v311_v18 = vld [vmem:[#allocation8 + $0x58] sm:$0xff]  ;;  %v310_v19 = vld [vmem:[#allocation8 + $0x50] sm:$0xff] }
  0x1c   :  { %v105_v24 = vsel %vm101_vm1, %v98_v15, %v95_v13  ;;  %v107_v25 = vrot.slane %v657_v6, 2  ;;  %vm110_vm2 = vcmp.lt.s32.totalorder %v100_v1, 6  ;;  %v116_v33 = vrot.slane %v657_v6, 3  ;;  %v314_v15 = vld [vmem:[#allocation8 + $0x70] sm:$0xff] }
  0x1d   :  { %v433_v27 = vpack.i.bf16 %v105_v24, %v102_v23  ;;  %444 = vrot.lane.b32.xlu1 %v443_v22, %s601_s3  ;;  %v103_v30 = vsel %vm101_vm1, %v96_v21, %v97_v14  ;;  %v104_v31 = vsel %vm101_vm1, %v95_v13, %v96_v21  ;;  %v111_v34 = vsel %vm110_vm2, %v108_v17, %v109_v20  ;;  %v308_v21 = vld [vmem:[#allocation8 + $0x40] sm:$0xff]  ;;  %v307_v22 = vld [vmem:[#allocation8 + $0x38] sm:$0xff]  ;;  %v306_v23 = vld [vmem:[#allocation8 + $0x30] sm:$0xff] }
  0x1e   :  { %v112_v28 = vsel %vm110_vm2, %v107_v25, %v108_v17  ;;  %v113_v29 = vsel %vm110_vm2, %v106_v16, %v107_v25  ;;  %v114_v35 = vsel %vm110_vm2, %v109_v20, %v106_v16  ;;  %v448_v37 = vpack.i.bf16 %v103_v30, %v104_v31  ;;  %v313_v16 = vld [vmem:[#allocation8 + $0x68] sm:$0xff]  ;;  %v312_v17 = vld [vmem:[#allocation8 + $0x60] sm:$0xff] }
  0x1f   :  { %434 = vrot.lane.b32.xlu0 %v433_v27, %s602_s4  ;;  %v453_v32 = vpack.i.bf16 %v112_v28, %v113_v29  ;;  %416 = vmatpush.bf16.msra.mxu2 %v402_v26  ;;  %v121_v38 = vsel %vm119_vm0, %v116_v33, %v117_v11  ;;  %v122_v39 = vsel %vm119_vm0, %v115_v10, %v116_v33  ;;  %vm182_vm5 = vcmask 785408   ;;  %v309_v20 = vld [vmem:[#allocation8 + $0x48] sm:$0xff]  ;;  %v304_v25 = vld [vmem:[#allocation8 + $0x20] sm:$0xff]  ;;  %v302_v27 = vld [vmem:[#allocation8 + $0x10] sm:$0xff] }
  0x20   :  { %259 = vmatpush.bf16.msra.mxu0 %v402_v26  ;;  %v438_v40 = vpack.i.bf16 %v114_v35, %v111_v34  ;;  %v458_v42 = vpack.i.bf16 %v121_v38, %v122_v39  ;;  %v305_v24 = vld [vmem:[#allocation8 + $0x28] sm:$0xff]  ;;  %v303_v26 = vld [vmem:[#allocation8 + $0x18] sm:$0xff]  ;;  %v300_v30 = vld [vmem:[#allocation8] sm:$0xff]  ;;  %vm322_vm6 = vcmask 1041409  }
  0x21   :  { %454 = vrot.lane.b32.xlu2 %v453_v32, %s594_s29  ;;  %v301_v28 = vld [vmem:[#allocation8 + $0x8] sm:$0xff]  ;;  %v463_v31 = vld [vmem:[%s712_s2] ss:$0 sm:$0xff]  ;;  %v281_v38 = vld [vmem:[#allocation7 + $0x8] sm:$0xff] }
  0x23   :  { %417 = vmatpush.bf16.msra.mxu2 %v401_v36 }
  0x24   :  { %260 = vmatpush.bf16.msra.mxu0 %v401_v36 }
  0x25   :  { %449 = vrot.lane.b32.xlu1 %v448_v37, %s602_s4  ;;  %v280_v37 = vld [vmem:[#allocation7] sm:$0xff] }
  0x27   :  { %439 = vrot.lane.b32.xlu0 %v438_v40, %s594_s29  ;;  %418 = vmatpush.bf16.msra.mxu2 %v400_v41 }
  0x28   :  { %261 = vmatpush.bf16.msra.mxu0 %v400_v41 }
  0x29   :  { %459 = vrot.lane.b32.xlu2 %v458_v42, %s601_s3 }
  0x2b   :  { %419 = vmatpush.bf16.msra.mxu2 %v399_v43 }
  0x2c   :  { %262 = vmatpush.bf16.msra.mxu0 %v399_v43 }
  0x2f   :  { %420 = vmatpush.bf16.msra.mxu2 %v398_v44 }
  0x30   :  { %263 = vmatpush.bf16.msra.mxu0 %v398_v44 }
  0x33   :  { %421 = vmatpush.bf16.msra.mxu2 %v397_v45 }
  0x34   :  { %264 = vmatpush.bf16.msra.mxu0 %v397_v45 }
  0x7b   :  { %v455_v46 = vpop.permute.xlu2 %454 }
  0x7c   :  { %v457_v52 = vunpack.i.h.bf16 %v455_v46  ;;  %v456_v53 = vunpack.i.l.bf16 %v455_v46 }
  0x83   :  { %v460_v49 = vpop.permute.xlu2 %459 }
  0x84   :  { %v462_v58 = vunpack.i.h.bf16 %v460_v49  ;;  %v461_v59 = vunpack.i.l.bf16 %v460_v49 }
  0x8f   :  { %v445_v47 = vpop.permute.xlu1 %444 }
  0x90   :  { %v447_v60 = vunpack.i.h.bf16 %v445_v47  ;;  %v446_v61 = vunpack.i.l.bf16 %v445_v47 }
  0x91   :  { %v435_v48 = vpop.permute.xlu0 %434 }
  0x92   :  { %v437_v50 = vunpack.i.h.bf16 %v435_v48  ;;  %v436_v51 = vunpack.i.l.bf16 %v435_v48 }
  0x94   :  { %v176_v0 = vsel %vm172_vm3, %v661_v8, %v437_v50  ;;  %v175_v1 = vsel %vm172_vm3, %v659_v7, %v436_v51 }
  0x97   :  { %v450_v54 = vpop.permute.xlu1 %449 }
  0x98   :  { %v452_v56 = vunpack.i.h.bf16 %v450_v54  ;;  %v451_v57 = vunpack.i.l.bf16 %v450_v54 }
  0x99   :  { %v440_v55 = vpop.permute.xlu0 %439 }
  0x9a   :  { %v442_v62 = vunpack.i.h.bf16 %v440_v55  ;;  %v441_v63 = vunpack.i.l.bf16 %v440_v55  ;;  %v174_v2 = vsel %vm172_vm3, %v657_v6, %v452_v56  ;;  %v173_v3 = vsel %vm172_vm3, %v655_v5, %v451_v57  ;;  %v315_v5 = vld [vmem:[#allocation8 + $0x78] sm:$0xff] }
  0x9b   :  { %v178_v10 = vsel %vm177_vm4, %v173_v3, %v456_v53  ;;  %v179_v11 = vsel %vm177_vm4, %v174_v2, %v457_v52  ;;  %325 = vmatpush.msra.mxu1 %v315_v5 }
  0x9c   :  { %v180_v4 = vsel %vm177_vm4, %v175_v1, %v441_v63  ;;  %v181_v9 = vsel %vm177_vm4, %v176_v0, %v442_v62  ;;  %v183_v7 = vsel %vm182_vm5, %v178_v10, %v461_v59  ;;  %v184_v13 = vsel %vm182_vm5, %v179_v11, %v462_v58  ;;  %v464_v0 = vld [vmem:[%s715_s5] ss:$0 sm:$0xff] }
  0x9d   :  { %v185_v12 = vsel %vm182_vm5, %v180_v4, %v446_v61  ;;  %v186_v8 = vsel %vm182_vm5, %v181_v9, %v447_v60  ;;  %v187_v14 = vpack.c.bf16 %v184_v13, %v183_v7  ;;  %326 = vmatpush.msra.mxu1 %v314_v15 }
  0x9e   :  { %v188_v6 = vpack.c.bf16 %v186_v8, %v185_v12 }
  0x9f   :  { %265 = vmatmul.bf16.vlgmr.msra.gmra.mxu0 %v187_v14  ;;  %327 = vmatpush.msra.mxu1 %v313_v16 }
  0xa0   :  { %270 = vmatmul.bf16.vlgmr.msra.gmra.mxu2 %v188_v6 }
  0xa1   :  { %328 = vmatpush.msra.mxu1 %v312_v17 }
  0xa3   :  { %329 = vmatpush.msra.mxu1 %v311_v18 }
  0xa5   :  { %330 = vmatpush.msra.mxu1 %v310_v19 }
  0xa7   :  { %331 = vmatpush.msra.mxu1 %v309_v20 }
  0xa9   :  { %332 = vmatpush.msra.mxu1 %v308_v21 }
  0xab   :  { %333 = vmatpush.msra.mxu1 %v307_v22 }
  0xad   :  { %334 = vmatpush.msra.mxu1 %v306_v23 }
  0xaf   :  { %335 = vmatpush.msra.mxu1 %v305_v24 }
  0xb1   :  { %336 = vmatpush.msra.mxu1 %v304_v25 }
  0xb3   :  { %337 = vmatpush.msra.mxu1 %v303_v26 }
  0xb5   :  { %338 = vmatpush.msra.mxu1 %v302_v27 }
  0xb7   :  { %339 = vmatpush.msra.mxu1 %v301_v28 }
  0xb9   :  { %340 = vmatpush.msra.mxu1 %v300_v30 }
 0x11c   :  { %v266_v29 = vpop.f32.mrf.mxu0 }
 0x11d   :  { %v267_v32 = vadd.f32 %v463_v31, %v266_v29 }
 0x11f   :  { %v276_v35 = vmax.f32 %v267_v32, 0.0 }
 0x121   :  { %v282_v41 = vmul.f32 %v280_v37, %v276_v35 }
 0x123   :  { %v271_v33 = vpop.f32.mrf.mxu2 }
 0x124   :  { %v268_v34 = vpop.f32.mrf.mxu0  ;;  %v272_v39 = vadd.f32 %v463_v31, %v271_v33 }
 0x125   :  { %v269_v36 = vadd.f32 %v463_v31, %v268_v34 }
 0x126   :  { %v278_v44 = vmax.f32 %v272_v39, 0.0 }
 0x127   :  { %v277_v40 = vmax.f32 %v269_v36, 0.0 }
 0x128   :  { %v284_v49 = vmul.f32 %v280_v37, %v278_v44 }
 0x129   :  { %v283_v42 = vmul.f32 %v281_v38, %v277_v40 }
 0x12b   :  { %v273_v43 = vpop.f32.mrf.mxu2  ;;  %v286_v45 = vmax.f32 %v282_v41, %v283_v42 }
 0x12c   :  { %v274_v46 = vadd.f32 %v463_v31, %v273_v43 }
 0x12d   :  { %v287_v47 = vrot.slane %v286_v45, 4 }
 0x12e   :  { %v279_v48 = vmax.f32 %v274_v46, 0.0 }
 0x12f   :  { %v288_v50 = vmax.f32 %v286_v45, %v287_v47 }
 0x130   :  { %v285_v51 = vmul.f32 %v281_v38, %v279_v48 }
 0x131   :  { %v289_v53 = vrot.slane %v288_v50, 2 }
 0x132   :  { %v293_v52 = vmax.f32 %v284_v49, %v285_v51 }
 0x133   :  { %v290_v56 = vmax.f32 %v288_v50, %v289_v53 }
 0x134   :  { %v294_v54 = vrot.slane %v293_v52, 4 }
 0x135   :  { %v291_v58 = vrot.slane %v290_v56, 1 }
 0x136   :  { %v295_v55 = vmax.f32 %v293_v52, %v294_v54 }
 0x137   :  { %v292_v61 = vmax.f32 %v290_v56, %v291_v58 }
 0x138   :  { %v296_v57 = vrot.slane %v295_v55, 2 }
 0x13a   :  { %v297_v59 = vmax.f32 %v295_v55, %v296_v57 }
 0x13c   :  { %v298_v60 = vrot.slane %v297_v59, 1 }
 0x13e   :  { %v299_v62 = vmax.f32 %v297_v59, %v298_v60 }
 0x140   :  { %v323_v63 = vsel %vm322_vm6, %v299_v62, %v292_v61 }
 0x141   :  { %341 = vmatmul.f32.vlgmr.msra.gmra.mxu1 %v323_v63 }
 0x1be   :  { %v342_v1 = vpop.f32.mrf.mxu1 }
 0x1bf   :  { %v343_v2 = vadd.f32 %v464_v0, %v342_v1 }
 0x1c1   :  { %345 = vst [vmem:[#allocation10] sm:$0x3] %v343_v2 }
 0x1c2   :  { %356 = dma.vmem_to_hbm [thread:$0]  %s352_s23, 32, %s354_s26, [#allocation4]  }
 0x1c3   :  { %591 = dma.done.wait [#allocation4], 32  }
 0x1c4   :  { %592 = vsyncadd [#allocation4], 4294967264 }
 0x1c5   :  { %361 = vsyncpa [#allocation3], 1 }
 0x1c6   :  { %362 = vsyncpa [#allocation6], 1 }
 0x1c7   :  { %363 = vsyncpa [#allocation9], 1 }
 0x1c8   :  { %364 = vsyncpa [#allocation4], 1 }

</bundles_post_ra>
